<compile_context>
chip_gen: v7x
topology: tpu7x:2x2x1
jax: 0.10.0
libtpu: 0.0.40
codegen_flags: <defaults>
</compile_context>

<pallas_src>
import functools
import math

import jax
import jax.numpy as jnp
from jax import lax
from jax.experimental import pallas as pl
from jax.experimental.pallas import tpu as pltpu


def make_pe_table(d_model: int, max_len: int = 5000,
                  dtype=jnp.float32) -> jax.Array:
    """Sinusoidal PE table, shape (max_len, d_model).

    Matches the PyTorch buffer values (the buffer is (max_len, 1, d_model));
    the dummy batch axis is dropped here and re-broadcast inside the kernel.
    """
    position = jnp.arange(max_len, dtype=jnp.float32)[:, None]           # (L, 1)
    div_term = jnp.exp(
        jnp.arange(0, d_model, 2, dtype=jnp.float32)
        * (-math.log(10000.0) / d_model))                                 # (D/2,)
    angles = position * div_term                                          # (L, D/2)
    # interleave: pe[:, 0::2] = sin, pe[:, 1::2] = cos
    pe = jnp.stack([jnp.sin(angles), jnp.cos(angles)], axis=-1)
    pe = pe.reshape(max_len, d_model)
    return pe.astype(dtype)


_HASH_MULT = 0x045D9F3B   # classic 32-bit avalanche constant (fits in int32)


def _pe_dropout_kernel(seed_ref, x_ref, pe_ref, o_ref, *,
                       batch: int, seq_tile: int,
                       drop_threshold: int, scale: float,
                       apply_dropout: bool):
    # x_ref / o_ref: (ts, B*D) lane-dense tiles.  pe_ref: (ts, D).
    pe_row = pe_ref[...].astype(x_ref.dtype)                       # (ts, D)
    if batch > 1:
        # Broadcast over batch = repeat along the lane axis (x's (B, D) pair
        # is folded into one contiguous lane axis of width B*D).
        pe_b = jnp.concatenate([pe_row] * batch, axis=1)           # (ts, B*D)
    else:
        pe_b = pe_row
    y = x_ref[...] + pe_b

    if apply_dropout:
        # Counter-based int32 hash PRNG: one stream over the whole array
        # (no per-tile reseeding), pure integer ops (portable: Mosaic and
        # interpret mode), integer-threshold keep test.
        # TODO(synk): torch.nn.Dropout's exact RNG stream is not reproducible.
        nrows, ncols = y.shape
        row0 = pl.program_id(0) * seq_tile
        rows = lax.broadcasted_iota(jnp.int32, (nrows, ncols), 0) + row0
        cols = lax.broadcasted_iota(jnp.int32, (nrows, ncols), 1)
        h = rows * jnp.int32(ncols) + cols                  # global element id
        h = h ^ seed_ref[0]
        h = h ^ lax.shift_right_logical(h, jnp.int32(16))
        h = h * jnp.int32(_HASH_MULT)
        h = h ^ lax.shift_right_logical(h, jnp.int32(16))
        h = h * jnp.int32(_HASH_MULT)
        h = h ^ lax.shift_right_logical(h, jnp.int32(16))
        bits24 = h & jnp.int32(0x00FFFFFF)                  # uniform on [0, 2^24)
        keep = bits24 >= jnp.int32(drop_threshold)          # P(keep) = 1 - p
        y = jnp.where(keep, y * jnp.asarray(scale, dtype=y.dtype),
                      jnp.zeros_like(y))

    o_ref[...] = y.astype(o_ref.dtype)


def _choose_seq_tile(seq_len: int, row_bytes: int,
                     target_tile_bytes: int = 4 * 1024 * 1024) -> int:
    """Rows per tile so one x tile is ~4 MiB: big enough to amortize the
    ~0.35 us per-grid-step pipeline overhead, small enough that the pipelined
    buffers (2x x-tile + 2x out-tile + pe tile ~ 16-17 MiB) plus kernel-body
    temporaries fit v7x's 64 MiB VMEM as well as v5e/v6e's 128 MiB."""
    ts = max(8, target_tile_bytes // max(1, row_bytes))
    ts = min(ts, seq_len)
    if ts >= 8:
        ts = (ts // 8) * 8          # sublane-aligned tile rows
    else:
        ts = seq_len                # tiny-S: single full-extent block (exempt)
    return max(1, ts)


def positional_encoding_forward(x: jax.Array,
                                pe: jax.Array,
                                *,
                                dropout_p: float = 0.1,
                                training: bool = True,
                                seed: int = 0,
                                seq_tile: int | None = None) -> jax.Array:
    """x: (S, B, D).  pe: (max_len, D) or (max_len, 1, D).  Returns (S, B, D)."""
    S, B, D = x.shape
    if pe.ndim == 3:                     # accept the PyTorch-shaped buffer too
        pe = pe.reshape(pe.shape[0], pe.shape[-1])
    max_len, d_model = pe.shape
    assert d_model == D and S <= max_len

    # Lane-dense view: (B, D) are contiguous, so this reshape is free and the
    # kernel's last axis is B*D wide (unmasked stores, fully packed vregs).
    x2d = x.reshape(S, B * D)
    row_bytes = B * D * x.dtype.itemsize

    if seq_tile is None:
        ts = _choose_seq_tile(S, row_bytes)
    else:
        ts = min(max(int(seq_tile), 1), S)
        ts = (ts // 8) * 8 if ts >= 8 else S
    grid = (pl.cdiv(S, ts),)

    # Pass the full PE table; the index_map selects the rows (no per-call
    # pe[:S] HBM slice).  Only in the degenerate S < 8 case do we slice so the
    # pe block equals the full array dims (exempt from the (8, 128) rule).
    pe_in = pe if ts % 8 == 0 else pe[:S]

    apply_dropout = bool(training) and float(dropout_p) > 0.0
    drop_threshold = min(int(round(float(dropout_p) * (1 << 24))), (1 << 24) - 1)
    scale = 1.0 / (1.0 - float(dropout_p)) if float(dropout_p) < 1.0 else 0.0

    kernel = functools.partial(
        _pe_dropout_kernel, batch=B, seq_tile=ts,
        drop_threshold=drop_threshold, scale=scale,
        apply_dropout=apply_dropout)

    seed_arr = jnp.array([seed], dtype=jnp.int32)

    out2d = pl.pallas_call(
        kernel,
        out_shape=jax.ShapeDtypeStruct((S, B * D), x.dtype),
        grid_spec=pltpu.PrefetchScalarGridSpec(
            num_scalar_prefetch=1,                      # seed lands in SMEM
            grid=grid,
            in_specs=[
                pl.BlockSpec((ts, B * D), lambda i, seed_ref: (i, 0)),
                pl.BlockSpec((ts, D), lambda i, seed_ref: (i, 0)),
            ],
            out_specs=pl.BlockSpec((ts, B * D), lambda i, seed_ref: (i, 0)),
        ),
        compiler_params=pltpu.CompilerParams(
            # Independent tiles -> let v7x shard them over both TensorCores.
            dimension_semantics=("parallel",),
            # ~17 MiB of double-buffered tiles + kernel-body temporaries;
            # explicit limit so the same tiling is safe on v7x (64 MiB VMEM).
            vmem_limit_bytes=48 * 1024 * 1024,
        ),
    )(seed_arr, x2d, pe_in)

    return out2d.reshape(S, B, D)


if __name__ == "__main__":
    # Small shapes consistent with the module's forward: (seq, batch, d_model).
    S, B, D = 8, 2, 32
    key = jax.random.PRNGKey(0)
    x = jax.random.normal(key, (S, B, D), dtype=jnp.float32)

    pe = make_pe_table(d_model=D, max_len=5000)          # (5000, D)

    # Training-mode forward (add PE + dropout) through the Pallas kernel.
    out_train = positional_encoding_forward(x, pe, dropout_p=0.1,
                                            training=True, seed=0)
    out_train = jax.block_until_ready(out_train)

    # Eval-mode forward (dropout is identity) -- check against pure JAX.
    out_eval = positional_encoding_forward(x, pe, dropout_p=0.1, training=False)
    out_eval = jax.block_until_ready(out_eval)

    base = x + pe[:S][:, None, :]
    assert out_train.shape == (S, B, D)
    assert jnp.allclose(out_eval, base, atol=1e-5), "eval-mode mismatch"

    # Train-mode semantic check: every element is either dropped (exact 0) or
    # the PE-added value scaled by 1/(1-p).
    scaled = base * (1.0 / (1.0 - 0.1))
    kept = jnp.isclose(out_train, scaled, atol=1e-5, rtol=1e-5)
    dropped = out_train == 0.0
    assert bool(jnp.all(kept | dropped)), "train-mode values not in {0, scaled}"
    drop_frac = float(jnp.mean(dropped.astype(jnp.float32)))
    assert 0.0 <= drop_frac < 0.6, f"implausible drop fraction {drop_frac}"

    print("KERNEL_OK")
</pallas_src>

<mosaic_0001>
module attributes {stable_mosaic.version = 11 : i64} {
  func.func @_pe_dropout_kernel(%arg0: i32, %arg1: memref<1xi32, #tpu.memory_space<smem>>, %arg2: memref<8x64xf32, #tpu.memory_space<vmem>>, %arg3: memref<8x32xf32, #tpu.memory_space<vmem>>, %arg4: memref<8x64xf32, #tpu.memory_space<vmem>>) attributes {dimension_semantics = [#tpu.dimension_semantics<parallel>], iteration_bounds = array<i64: 1>, scalar_prefetch = 1 : i64, scratch_operands = 0 : i64, tpu.core_type = #tpu.core_type<tc>, window_params = [{transform_indices = @transform_0, window_bounds = array<i64: 8, 64>}, {transform_indices = @transform_1, window_bounds = array<i64: 8, 32>}, {transform_indices = @transform_2, window_bounds = array<i64: 8, 64>}]} {
    %c0 = arith.constant 0 : index
    %c0_0 = arith.constant 0 : index
    %0 = vector.load %arg3[%c0, %c0_0] : memref<8x32xf32, #tpu.memory_space<vmem>>, vector<8x32xf32>
    %1 = tpu.concatenate %0, %0 in 1 : vector<8x32xf32>, vector<8x32xf32> -> vector<8x64xf32>
    %c0_1 = arith.constant 0 : index
    %c0_2 = arith.constant 0 : index
    %2 = vector.load %arg2[%c0_1, %c0_2] : memref<8x64xf32, #tpu.memory_space<vmem>>, vector<8x64xf32>
    %3 = arith.addf %2, %1 : vector<8x64xf32>
    %c8_i32 = arith.constant 8 : i32
    %4 = arith.muli %arg0, %c8_i32 : i32
    %5 = tpu.iota {dimensions = array<i32: 0>} : vector<8x64xi32>
    %6 = vector.broadcast %4 : i32 to vector<8x64xi32>
    %7 = arith.addi %5, %6 : vector<8x64xi32>
    %8 = tpu.iota {dimensions = array<i32: 1>} : vector<8x64xi32>
    %c64_i32 = arith.constant 64 : i32
    %9 = vector.broadcast %c64_i32 : i32 to vector<8x64xi32>
    %10 = arith.muli %7, %9 : vector<8x64xi32>
    %11 = arith.addi %10, %8 : vector<8x64xi32>
    %c0_3 = arith.constant 0 : index
    %12 = memref.load %arg1[%c0_3] : memref<1xi32, #tpu.memory_space<smem>>
    %13 = vector.broadcast %12 : i32 to vector<8x64xi32>
    %14 = arith.xori %11, %13 : vector<8x64xi32>
    %c16_i32 = arith.constant 16 : i32
    %15 = vector.broadcast %c16_i32 : i32 to vector<8x64xi32>
    %16 = arith.shrui %14, %15 : vector<8x64xi32>
    %17 = arith.xori %14, %16 : vector<8x64xi32>
    %c73244475_i32 = arith.constant 73244475 : i32
    %18 = vector.broadcast %c73244475_i32 : i32 to vector<8x64xi32>
    %19 = arith.muli %17, %18 : vector<8x64xi32>
    %c16_i32_4 = arith.constant 16 : i32
    %20 = vector.broadcast %c16_i32_4 : i32 to vector<8x64xi32>
    %21 = arith.shrui %19, %20 : vector<8x64xi32>
    %22 = arith.xori %19, %21 : vector<8x64xi32>
    %c73244475_i32_5 = arith.constant 73244475 : i32
    %23 = vector.broadcast %c73244475_i32_5 : i32 to vector<8x64xi32>
    %24 = arith.muli %22, %23 : vector<8x64xi32>
    %c16_i32_6 = arith.constant 16 : i32
    %25 = vector.broadcast %c16_i32_6 : i32 to vector<8x64xi32>
    %26 = arith.shrui %24, %25 : vector<8x64xi32>
    %27 = arith.xori %24, %26 : vector<8x64xi32>
    %c16777215_i32 = arith.constant 16777215 : i32
    %28 = vector.broadcast %c16777215_i32 : i32 to vector<8x64xi32>
    %29 = arith.andi %27, %28 : vector<8x64xi32>
    %c1677722_i32 = arith.constant 1677722 : i32
    %30 = vector.broadcast %c1677722_i32 : i32 to vector<8x64xi32>
    %31 = arith.cmpi sge, %29, %30 : vector<8x64xi32>
    %cst = arith.constant 1.11111116 : f32
    %32 = vector.broadcast %cst : f32 to vector<8x64xf32>
    %33 = arith.mulf %3, %32 : vector<8x64xf32>
    %cst_7 = arith.constant 0.000000e+00 : f32
    %34 = vector.broadcast %cst_7 : f32 to vector<8x64xf32>
    %35 = arith.select %31, %33, %34 : vector<8x64xi1>, vector<8x64xf32>
    %c0_8 = arith.constant 0 : index
    %c0_9 = arith.constant 0 : index
    %36 = vector.load %arg4[%c0_8, %c0_9] : memref<8x64xf32, #tpu.memory_space<vmem>>, vector<8x64xf32>
    tpu.vector_store %arg4[%c0_8, %c0_9], %35 {strides = array<i32>} : memref<8x64xf32, #tpu.memory_space<vmem>>, vector<8x64xf32>,
    return
  }
  func.func @transform_0(%arg0: i32, %arg1: memref<1xi32, #tpu.memory_space<smem>>) -> (i32, i32) {
    %c0_i32 = arith.constant 0 : i32
    %c0_i32_0 = arith.constant 0 : i32
    return %arg0, %c0_i32 : i32, i32
  }
  func.func @transform_1(%arg0: i32, %arg1: memref<1xi32, #tpu.memory_space<smem>>) -> (i32, i32) {
    %c0_i32 = arith.constant 0 : i32
    %c0_i32_0 = arith.constant 0 : i32
    return %arg0, %c0_i32 : i32, i32
  }
  func.func @transform_2(%arg0: i32, %arg1: memref<1xi32, #tpu.memory_space<smem>>) -> (i32, i32) {
    %c0_i32 = arith.constant 0 : i32
    %c0_i32_0 = arith.constant 0 : i32
    return %arg0, %c0_i32 : i32, i32
  }
}

</mosaic_0001>

<bundles_post_ra>
// kernel: tpu_custom_call.1
= control target key start
LH: loop header
LB: loop body
LE: loop exit
PB: predicated region body
PF: predicated region fallthrough
CT: control target
= control target key end

     0   :  { %s132_s0 = inlined_call_operand.<no memory space> [shape: s32[1], index: 0, kind: input, shape index: {}]   ;;  %s133_s1 = inlined_call_operand.vmem [shape: f32[8,64], index: 1, kind: input, shape index: {}]   ;;  %s134_s2 = inlined_call_operand.vmem [shape: f32[5000,32], index: 2, kind: input, shape index: {}]   ;;  %s135_s3 = inlined_call_operand.hbm [shape: f32[8,64], index: 3, kind: output, shape index: {}]  }
   0x1   :  { %v14_v0 = vld [vmem:[%s134_s2] sm:$0xff] }
   0x2   :  { %9 = vsyncpa [#allocation5], 0  ;;  %s89_s14 = smov 32   ;;  %v24_v1 = vlaneseq  ;;  %v33_v6 = vstv %s132_s0  ;;  %vm19_vm0 = vcmask 261120   ;;  %v21_v16 = vld [vmem:[%s133_s1] sm:$0xff]  ;;  %s90_s18 = smov [#allocation4]  }
   0x3   :  { %16 = vrot.lane.b32.xlu0 %v14_v0, %s89_s14  ;;  %s55_s0 = sshll.u32 %s90_s18, 4  ;;  %vm47_vm2 = vcmask 523264   ;;  %s56_s0 = int_to_ptr.vmem [resolvable:$true] %s55_s0 }
   0x4   :  { %v25_v2 = vshrl.u32 %v24_v1, 7  ;;  %v29_v3 = vand.u32 127, %v24_v1  ;;  %s65_s19 = scalar_lea.vmem %s56_s0, 128  ;;  %p70_p1 = scmp.lt.s32.totalorder %s56_s0, %s56_s0 }
   0x5   :  { %p66_p0 = scmp.ne.s32.totalorder %s56_s0, %s65_s19  ;;  %p71_p2 = scmp.lt.s32.totalorder %s65_s19, %s65_s19 }
   0x6   :  { %v30_v4 = vmul.u32 64, %v25_v2 }
   0x7   :  { %p72_p3 = por %p71_p2, %p70_p1 }
   0x8   :  { %v31_v5 = vadd.s32 %v30_v4, %v29_v3 }
   0x9   :  { %p73_p4 = pnand %p72_p3, %p66_p0 }
   0xa   :  { %v34_v7 = vxor.u32 %v33_v6, %v31_v5 }
   0xc   :  { %v35_v8 = vshrl.u32 %v34_v7, 16 }
   0xe   :  { %v36_v9 = vxor.u32 %v35_v8, %v34_v7 }
  0x10   :  { %v37_v10 = vmul.u32 73244475, %v36_v9 }
  0x12   :  { %v38_v11 = vshrl.u32 %v37_v10, 16 }
  0x14   :  { %v39_v12 = vxor.u32 %v38_v11, %v37_v10 }
  0x16   :  { %v40_v13 = vmul.u32 73244475, %v39_v12 }
  0x18   :  { %v41_v14 = vshrl.u32 %v40_v13, 16 }
  0x1a   :  { %v42_v15 = vxor.u32 %v41_v14, %v40_v13 }
  0x1c   :  { %v43_v17 = vand.u32 16777215, %v42_v15 }
  0x1e   :  { %vm44_vm1 = vcmp.ge.s32.totalorder %v43_v17, 1677722 }
  0x75   :  { %v17_v18 = vpop.permute.xlu0 %16 }
  0x76   :  { %v20_v19 = vsel %vm19_vm0, %v14_v0, %v17_v18 }
  0x77   :  { %v22_v20 = vadd.f32 %v21_v16, %v20_v19 }
  0x79   :  { %v45_v21 = vmul.f32 1.1111112, %v22_v20 }
  0x7b   :  { %v46_v22 = vsel %vm44_vm1, %v45_v21, 0.0 }
  0x7c   :  { %48 = vst.msk [vmem:[#allocation4] sm:$0xff] %vm47_vm2, %v46_v22 }
  0x7d   :  { %76 = shalt.err (!%p73_p4)
}
  0x7e   :  { %s77_s21 = scalar_lea.hbm %s135_s3, 128 }
  0x7f   :  { %p78_p5 = scmp.ne.s32.totalorder %s135_s3, %s77_s21  ;;  %p81_p6 = scmp.lt.u32.totalorder %s77_s21, %s135_s3 }
  0x81   :  { %p83_p7 = pnand %p81_p6, %p78_p5 }
  0x83   :  { %86 = shalt.err (!%p83_p7)
}
  0x84   :  { %58 = dma.vmem_to_hbm [thread:$0]  %s56_s0, 128, %s135_s3, [#allocation5]  }
  0x85   :  { %87 = dma.done.wait [#allocation5], 128  }
  0x86   :  { %88 = vsyncadd [#allocation5], 4294967168 }
  0x87   :  { %62 = vsyncpa [#allocation5], 1 }

</bundles_post_ra>
